<compile_context>
chip_gen: v5e
topology: v5e:2x2
jax: 0.10.0
libtpu: 0.0.40
codegen_flags: <defaults>
</compile_context>

<pallas_src>
import jax
import jax.numpy as jnp
from jax.experimental import pallas as pl
from jax.experimental.pallas import tpu as pltpu


def feedforward_kernel(x_ref, w1_ref, b1_ref, w2_ref, b2_ref, o_ref):
    # Hidden layer on the MXU, tanh on the EUP:
    #   (tm, n_in) @ (n_in, n_hidden) + (1, n_hidden) -> (tm, n_hidden)
    h = jnp.tanh(
        jnp.dot(x_ref[...], w1_ref[...], preferred_element_type=jnp.float32)
        + b1_ref[...]
    )
    # Output layer: contract hidden axis of w2_row (1, H) with hidden axis of
    # h (tm, H) -> (1, tm).  Per-row outputs land along lanes, so the store
    # below is a full-width lane-dense vst instead of a masked column store.
    y = jax.lax.dot_general(
        w2_ref[...],
        h,
        dimension_numbers=(((1,), (1,)), ((), ())),
        preferred_element_type=jnp.float32,
    )
    o_ref[0] = y + b2_ref[...]  # (1, tm) + (1, 1) -> (1, tm)


def _pick_tm(batch, n_in):
    """Batch tile: whole batch for small B (single grid step); otherwise the
    largest multiple of 128 keeping the two pipelined x buffers well inside
    v5e's 16 MiB scoped-VMEM default (capped at 1024 so B > 1024 still yields
    multiple parallel grid steps for v7x's two TensorCores)."""
    if batch <= 1024:
        return batch
    budget = 6 * 1024 * 1024                  # bytes for the 2 pipelined x buffers
    tm = budget // (2 * n_in * 4)
    return max(128, min(1024, (tm // 128) * 128))


def feedforward(x, w1, b1, w2, b2, *, tm=None):
    """y = tanh(x @ w1 + b1) @ w2 + b2, returned as (B, 1) float32."""
    x = x.astype(jnp.float32)
    B, n_in = x.shape
    n_hidden = w1.shape[1]

    # TPU-friendly 2-D parameter layouts.
    w1 = w1.astype(jnp.float32)
    w2_row = w2.reshape(1, n_hidden).astype(jnp.float32)
    b1 = b1.reshape(1, n_hidden).astype(jnp.float32)
    b2 = b2.reshape(1, 1).astype(jnp.float32)

    if tm is None:
        tm = _pick_tm(B, n_in)
    n_tiles = pl.cdiv(B, tm)
    B_pad = n_tiles * tm
    if B_pad != B:  # remainder handling: pad batch, slice result afterwards
        x = jnp.pad(x, ((0, B_pad - B), (0, 0)))

    cost = pl.CostEstimate(
        flops=2 * B_pad * n_in * n_hidden + 2 * B_pad * n_hidden,
        transcendentals=B_pad * n_hidden,
        bytes_accessed=4 * (B_pad * n_in + n_in * n_hidden + 2 * n_hidden + 1
                            + n_tiles * tm),
    )

    out = pl.pallas_call(
        feedforward_kernel,
        # Lane-dense output slab: (n_tiles, 1, tm); reshaped to (B, 1) below.
        out_shape=jax.ShapeDtypeStruct((n_tiles, 1, tm), jnp.float32),
        grid_spec=pltpu.PrefetchScalarGridSpec(
            num_scalar_prefetch=0,
            grid=(n_tiles,),
            in_specs=[
                pl.BlockSpec((tm, n_in), lambda i: (i, 0)),        # x tile
                pl.BlockSpec((n_in, n_hidden), lambda i: (0, 0)),  # W1 (resident)
                pl.BlockSpec((1, n_hidden), lambda i: (0, 0)),     # b1 (resident)
                pl.BlockSpec((1, n_hidden), lambda i: (0, 0)),     # w2 row (resident)
                pl.BlockSpec((1, 1), lambda i: (0, 0)),            # b2 (resident)
            ],
            out_specs=pl.BlockSpec((1, 1, tm), lambda i: (i, 0, 0)),
        ),
        compiler_params=pltpu.CompilerParams(
            dimension_semantics=("parallel",),
        ),
        cost_estimate=cost,
    )(x, w1, b1, w2_row, b2)

    # (n_tiles, 1, tm) row-major == batch order; trim padding, present as (B, 1).
    return out.reshape(B_pad, 1)[:B]


def init_params(key, n_inputs, n_hidden):
    """Deterministic init mimicking nn.Linear's uniform(-1/sqrt(fan_in), 1/sqrt(fan_in))."""
    k1, k2, k3, k4 = jax.random.split(key, 4)
    bound1 = 1.0 / jnp.sqrt(n_inputs)
    bound2 = 1.0 / jnp.sqrt(n_hidden)
    w1 = jax.random.uniform(k1, (n_inputs, n_hidden), jnp.float32, -bound1, bound1)
    b1 = jax.random.uniform(k2, (1, n_hidden), jnp.float32, -bound1, bound1)
    w2 = jax.random.uniform(k3, (n_hidden, 1), jnp.float32, -bound2, bound2)
    b2 = jax.random.uniform(k4, (1, 1), jnp.float32, -bound2, bound2)
    return w1, b1, w2, b2


if __name__ == "__main__":
    key = jax.random.PRNGKey(0)
    kx, kp, kx2 = jax.random.split(key, 3)

    # Small shapes consistent with the module (nonlinear regression MLP).
    B, n_inputs, n_hidden = 16, 32, 32
    x = jax.random.normal(kx, (B, n_inputs), jnp.float32)
    w1, b1, w2, b2 = init_params(kp, n_inputs, n_hidden)

    # Small batch: single grid step, whole batch in one tile.
    y = jax.block_until_ready(feedforward(x, w1, b1, w2, b2))
    y_ref = jnp.tanh(x @ w1 + b1) @ w2 + b2
    assert y.shape == (B, 1)
    assert jnp.allclose(y, y_ref, atol=1e-5, rtol=1e-5), "mismatch vs reference (B=16)"

    # Multi-tile grid + batch-remainder (padding) path.
    B2 = 300
    x2 = jax.random.normal(kx2, (B2, n_inputs), jnp.float32)
    y2 = jax.block_until_ready(feedforward(x2, w1, b1, w2, b2, tm=128))
    y2_ref = jnp.tanh(x2 @ w1 + b1) @ w2 + b2
    assert y2.shape == (B2, 1)
    assert jnp.allclose(y2, y2_ref, atol=1e-5, rtol=1e-5), "mismatch vs reference (B=300)"

    # Auto-tile path (no tm given) on a non-power-of-two batch: tm == B, one step.
    y3 = jax.block_until_ready(feedforward(x2, w1, b1, w2, b2))
    assert y3.shape == (B2, 1)
    assert jnp.allclose(y3, y2_ref, atol=1e-5, rtol=1e-5), "mismatch vs reference (auto tm)"

    print("KERNEL_OK")
</pallas_src>

<mosaic_0001>
module attributes {stable_mosaic.version = 11 : i64} {
  func.func @feedforward_kernel(%arg0: i32, %arg1: memref<16x32xf32, #tpu.memory_space<vmem>>, %arg2: memref<32x32xf32, #tpu.memory_space<vmem>>, %arg3: memref<1x32xf32, #tpu.memory_space<vmem>>, %arg4: memref<1x32xf32, #tpu.memory_space<vmem>>, %arg5: memref<1x1xf32, #tpu.memory_space<vmem>>, %arg6: memref<1x1x16xf32, #tpu.memory_space<vmem>>) attributes {dimension_semantics = [#tpu.dimension_semantics<parallel>], iteration_bounds = array<i64: 1>, scalar_prefetch = 0 : i64, scratch_operands = 0 : i64, tpu.core_type = #tpu.core_type<tc>, window_params = [{transform_indices = @transform_0, window_bounds = array<i64: 16, 32>}, {pipeline_mode = #tpu.pipeline_mode<synchronous>, transform_indices = @transform_1, window_bounds = array<i64: 32, 32>}, {pipeline_mode = #tpu.pipeline_mode<synchronous>, transform_indices = @transform_2, window_bounds = array<i64: 1, 32>}, {pipeline_mode = #tpu.pipeline_mode<synchronous>, transform_indices = @transform_3, window_bounds = array<i64: 1, 32>}, {pipeline_mode = #tpu.pipeline_mode<synchronous>, transform_indices = @transform_4, window_bounds = array<i64: 1, 1>}, {transform_indices = @transform_5, window_bounds = array<i64: 1, 1, 16>}]} {
    %c0 = arith.constant 0 : index
    %c0_0 = arith.constant 0 : index
    %0 = vector.load %arg1[%c0, %c0_0] : memref<16x32xf32, #tpu.memory_space<vmem>>, vector<16x32xf32>
    %c0_1 = arith.constant 0 : index
    %c0_2 = arith.constant 0 : index
    %1 = vector.load %arg2[%c0_1, %c0_2] : memref<32x32xf32, #tpu.memory_space<vmem>>, vector<32x32xf32>
    %cst = arith.constant dense<0.000000e+00> : vector<16x32xf32>
    %2 = tpu.matmul %0, %1, %cst {dimension_numbers = #tpu.dot_dimension_numbers<[1], [0], [0], [1], [0, 0, 1, 1], [], []>} : vector<16x32xf32>, vector<32x32xf32>, vector<16x32xf32> -> vector<16x32xf32>
    %c0_3 = arith.constant 0 : index
    %c0_4 = arith.constant 0 : index
    %3 = vector.load %arg3[%c0_3, %c0_4] : memref<1x32xf32, #tpu.memory_space<vmem>>, vector<1x32xf32>
    %4 = vector.broadcast %3 : vector<1x32xf32> to vector<16x32xf32>
    %5 = arith.addf %2, %4 : vector<16x32xf32>
    %6 = math.tanh %5 : vector<16x32xf32>
    %c0_5 = arith.constant 0 : index
    %c0_6 = arith.constant 0 : index
    %7 = vector.load %arg4[%c0_5, %c0_6] : memref<1x32xf32, #tpu.memory_space<vmem>>, vector<1x32xf32>
    %cst_7 = arith.constant dense<0.000000e+00> : vector<1x16xf32>
    %8 = tpu.matmul %7, %6, %cst_7 {dimension_numbers = #tpu.dot_dimension_numbers<[1], [1], [0], [0], [0, 0, 1, 0], [], []>} : vector<1x32xf32>, vector<16x32xf32>, vector<1x16xf32> -> vector<1x16xf32>
    %c0_8 = arith.constant 0 : index
    %c0_9 = arith.constant 0 : index
    %9 = vector.load %arg5[%c0_8, %c0_9] : memref<1x1xf32, #tpu.memory_space<vmem>>, vector<1x1xf32>
    %10 = vector.broadcast %9 : vector<1x1xf32> to vector<1x16xf32>
    %11 = arith.addf %8, %10 : vector<1x16xf32>
    %c0_10 = arith.constant 0 : index
    %c0_11 = arith.constant 0 : index
    %c0_12 = arith.constant 0 : index
    %12 = vector.load %arg6[%c0_10, %c0_11, %c0_12] : memref<1x1x16xf32, #tpu.memory_space<vmem>>, vector<1x1x16xf32>
    %13 = vector.shape_cast %12 : vector<1x1x16xf32> to vector<1x16xf32>
    %14 = vector.shape_cast %11 : vector<1x16xf32> to vector<1x1x16xf32>
    tpu.vector_store %arg6[%c0_10, %c0_11, %c0_12], %14 {strides = array<i32>} : memref<1x1x16xf32, #tpu.memory_space<vmem>>, vector<1x1x16xf32>,
    return
  }
  func.func @transform_0(%arg0: i32) -> (i32, i32) {
    %c0_i32 = arith.constant 0 : i32
    %c0_i32_0 = arith.constant 0 : i32
    return %arg0, %c0_i32 : i32, i32
  }
  func.func @transform_1(%arg0: i32) -> (i32, i32) {
    %c0_i32 = arith.constant 0 : i32
    %c0_i32_0 = arith.constant 0 : i32
    %c0_i32_1 = arith.constant 0 : i32
    return %c0_i32, %c0_i32_0 : i32, i32
  }
  func.func @transform_2(%arg0: i32) -> (i32, i32) {
    %c0_i32 = arith.constant 0 : i32
    %c0_i32_0 = arith.constant 0 : i32
    %c0_i32_1 = arith.constant 0 : i32
    return %c0_i32, %c0_i32_0 : i32, i32
  }
  func.func @transform_3(%arg0: i32) -> (i32, i32) {
    %c0_i32 = arith.constant 0 : i32
    %c0_i32_0 = arith.constant 0 : i32
    %c0_i32_1 = arith.constant 0 : i32
    return %c0_i32, %c0_i32_0 : i32, i32
  }
  func.func @transform_4(%arg0: i32) -> (i32, i32) {
    %c0_i32 = arith.constant 0 : i32
    %c0_i32_0 = arith.constant 0 : i32
    %c0_i32_1 = arith.constant 0 : i32
    return %c0_i32, %c0_i32_0 : i32, i32
  }
  func.func @transform_5(%arg0: i32) -> (i32, i32, i32) {
    %c0_i32 = arith.constant 0 : i32
    %c0_i32_0 = arith.constant 0 : i32
    %c0_i32_1 = arith.constant 0 : i32
    return %arg0, %c0_i32, %c0_i32_0 : i32, i32, i32
  }
}

</mosaic_0001>

<bundles_post_ra>
// kernel: tpu_custom_call.1
= control target key start
LH: loop header
LB: loop body
LE: loop exit
PB: predicated region body
PF: predicated region fallthrough
CT: control target
= control target key end

     0   :  { %s312_s0 = inlined_call_operand.hbm [shape: f32[16,32], index: 0, kind: input, shape index: {}]   ;;  %s313_s1 = inlined_call_operand.hbm [shape: f32[32,32], index: 1, kind: input, shape index: {}]   ;;  %s314_s2 = inlined_call_operand.vmem [shape: f32[1,32], index: 2, kind: input, shape index: {}]   ;;  %s315_s3 = inlined_call_operand.vmem [shape: f32[1,32], index: 3, kind: input, shape index: {}]   ;;  %s316_s4 = inlined_call_operand.<no memory space> [shape: f32[1,1], index: 4, kind: input, shape index: {}]   ;;  %s317_s5 = inlined_call_operand.hbm [shape: f32[1,1,16], index: 5, kind: output, shape index: {}]  }
   0x1   :  { %v10_v0 = vstv %s316_s4 }
   0x2   :  { %11 = vst [vmem:[#allocation2] sm:$0x1] %v10_v0 }
   0x3   :  { %12 = vsyncpa [#allocation4], 0 }
   0x4   :  { %13 = vsyncpa [#allocation7], 0 }
   0x5   :  { %14 = vsyncpa [#allocation5], 0  ;;  %s19_s22 = sshll.u32 %s312_s0, 4  ;;  %s253_s23 = smov [#allocation3]   ;;  %s20_s22 = int_to_ptr.hbm [resolvable:$true] %s19_s22 }
   0x6   :  { %s21_s24 = sshll.u32 %s253_s23, 4  ;;  %s32_s27 = sshll.u32 %s313_s1, 4  ;;  %s22_s24 = int_to_ptr.vmem [resolvable:$true] %s21_s24  ;;  %s33_s27 = int_to_ptr.hbm [resolvable:$true] %s32_s27 }
   0x7   :  { %s254_s28 = smov 128   ;;  %s255_s29 = smov 8  }
   0x8   :  { %27 = dma.hbm_to_vmem [thread:$0]  %s20_s22, 256, %s22_s24, [#allocation4], %s254_s28, %s254_s28, %s255_s29  }
   0x9   :  { %s256_s4 = smov [#allocation6]  }
   0xa   :  { %s34_s30 = sshll.u32 %s256_s4, 4  ;;  %s35_s30 = int_to_ptr.vmem [resolvable:$true] %s34_s30 }
   0xb   :  { %40 = dma.hbm_to_vmem [thread:$0]  %s33_s27, 512, %s35_s30, [#allocation7], %s254_s28, %s254_s28, %s255_s29  }
   0xc   :  { %247 = dma.done.wait [#allocation4], 256  }
   0xd   :  { %248 = vsyncadd [#allocation4], 4294967040 }
   0xe   :  { %249 = dma.done.wait [#allocation7], 512  }
   0xf   :  { %250 = vsyncadd [#allocation7], 4294966784  ;;  %v60_v1 = vld [vmem:[#allocation6 + $0x18] sm:$0xff]  ;;  %v59_v2 = vld [vmem:[#allocation6 + $0x10] sm:$0xff]  ;;  %vm65_vm0 = vcmask 261120   ;;  %v257_v8 = vmov 0  }
  0x10   :  { %159 = vmatpush.msra.mxu2 %v60_v1  ;;  %84 = vmatpush.msra.mxu0 %v60_v1  ;;  %v58_v3 = vld [vmem:[#allocation6 + $0x8] sm:$0xff]  ;;  %v57_v4 = vld [vmem:[#allocation6] sm:$0xff]  ;;  %v56_v5 = vld [vmem:[#allocation3 + $0x8] sm:$0xff]  ;;  %s143_s11 = sshll.u32 %s317_s5, 4  ;;  %vm134_vm1 = vcmask 122880   ;;  %s144_s11 = int_to_ptr.hbm [resolvable:$true] %s143_s11 }
  0x11   :  { %v55_v6 = vld [vmem:[#allocation3] sm:$0xff]  ;;  %v98_v7 = vld [vmem:[#allocation2] sm:$0x1]  ;;  %169 = vset.pattern.permute.xlu0 %v257_v8 }
  0x12   :  { %160 = vmatpush.msra.mxu2 %v59_v2  ;;  %85 = vmatpush.msra.mxu0 %v59_v2  ;;  %v170_v9 = vld [vmem:[%s314_s2] ss:$0 sm:$0xff]  ;;  %s258_s2 = smov [#allocation8]  }
  0x13   :  { %101 = vperm.xlu0 %169, %v98_v7   ;;  %v97_v16 = vld [vmem:[%s315_s3] sm:$0x1]  ;;  %s141_s8 = sshll.u32 %s258_s2, 4  ;;  %s142_s8 = int_to_ptr.vmem [resolvable:$true] %s141_s8 }
  0x14   :  { %161 = vmatpush.msra.mxu2 %v58_v3  ;;  %86 = vmatpush.msra.mxu0 %v58_v3 }
  0x16   :  { %162 = vmatpush.msra.mxu2 %v57_v4  ;;  %87 = vmatpush.msra.mxu0 %v57_v4 }
  0x17   :  { %155 = vmatmul.msk.f32.vlgmr.msra.gmra.mxu2 %vm65_vm0, %v56_v5  ;;  %154 = vmatmul.msk.f32.vlgmr.msra.gmra.mxu0 %vm65_vm0, %v55_v6 }
  0x85   :  { %v102_v17 = vpop.permute.xlu0 %101 }
  0x86   :  { %v104_v18 = vperm.slane %v102_v17, 0 }
  0x94   :  { %v89_v10 = vpop.f32.mrf.mxu0 }
  0x95   :  { %v90_v13 = vadd.f32 %v170_v9, %v89_v10 }
  0x9a   :  { %v92_v11 = vpop.f32.mrf.mxu2 }
  0x9b   :  { %v93_v12 = vadd.f32 %v170_v9, %v92_v11 }
  0x9d   :  { %171 = vtanh.f32 %v93_v12 }
  0x9e   :  { %173 = vtanh.f32 %v90_v13 }
  0xa3   :  { %v172_v14 = vpop.eup %171 }
  0xa4   :  { %156 = vmatpush.xpose.msk.msra.mxu1 %vm65_vm0, %v172_v14  ;;  %v174_v15 = vpop.eup %173 }
  0xa8   :  { %157 = vmatpush.xpose.msk.msra.mxu1 %vm65_vm0, %v174_v15 }
  0xab   :  { %158 = vmatmul.msk.f32.vlgmr.msra.gmra.mxu1 %vm65_vm0, %v97_v16 }
 0x128   :  { %v131_v19 = vpop.f32.mrf.mxu1 }
 0x129   :  { %v132_v20 = vadd.f32 %v131_v19, %v104_v18 }
 0x12b   :  { %135 = vst.msk [vmem:[#allocation8] sm:$0x1] %vm134_vm1, %v132_v20 }
 0x12c   :  { %146 = dma.vmem_to_hbm [thread:$0]  %s142_s8, 16, %s144_s11, [#allocation5]  }
 0x12d   :  { %251 = dma.done.wait [#allocation5], 16  }
 0x12e   :  { %252 = vsyncadd [#allocation5], 4294967280 }
 0x12f   :  { %151 = vsyncpa [#allocation4], 1 }
 0x130   :  { %152 = vsyncpa [#allocation7], 1 }
 0x131   :  { %153 = vsyncpa [#allocation5], 1 }

</bundles_post_ra>
